<compile_context>
chip_gen: v6e
topology: v6e:2x2x1
jax: 0.10.0
libtpu: 0.0.40
codegen_flags: <defaults>
</compile_context>

<pallas_src>
import math
import functools

import jax
import jax.numpy as jnp
from jax import lax
from jax.experimental import pallas as pl
from jax.experimental.pallas import tpu as pltpu


# ----------------------------- small helpers ---------------------------------

def _ceil_to(x, m):
    return ((x + m - 1) // m) * m


def _slab_offsets(H, F):
    """128-lane-aligned segment offsets inside the per-layer weight slab."""
    off_wo = _ceil_to(3 * H, 128)
    off_w1 = off_wo + _ceil_to(H, 128)
    w_tot = off_w1 + _ceil_to(F, 128)
    bias_w = _ceil_to(max(3 * H, F, H), 128)
    return off_wo, off_w1, w_tot, bias_w


def _layernorm(x, gamma, beta, eps=1e-6):
    mu = jnp.mean(x, axis=-1, keepdims=True)
    xc = x - mu
    var = jnp.mean(xc * xc, axis=-1, keepdims=True)
    return xc * lax.rsqrt(var + eps) * gamma + beta


def _gelu_exact(x):
    # nn.GELU() default (exact erf formulation), computed in f32.
    return 0.5 * x * (1.0 + lax.erf(x * 0.7071067811865476))


# ------------------------------ fused kernel body ------------------------------

def fused_transformer_kernel(x_ref, ew_ref, eb_ref, w_ref, w2_ref, b_ref,
                             ow_ref, ob_ref, o_ref, h_scr,
                             *, num_heads, num_layers, bpb, seq, hidden, ff,
                             off_wo, off_w1):
    l = pl.program_id(1)
    bf16, f32 = jnp.bfloat16, jnp.float32
    H, F = hidden, ff
    nh = num_heads
    hd = H // nh
    R = bpb * seq                                                  # rows per block

    # ---- layer 0 prologue: embedding into the resident VMEM activation.
    @pl.when(l == 0)
    def _():
        x = x_ref[...].astype(bf16)                                # [R, Din]
        h_scr[...] = (jnp.dot(x, ew_ref[...], preferred_element_type=f32)
                      + eb_ref[...])

    h = h_scr[...]                                                 # [R, H] f32
    hb = h.astype(bf16)

    # ---- per-layer parameters (3 consolidated slabs, static aligned offsets).
    wqkv = w_ref[0, :, 0:3 * H]                                    # [H, 3H] bf16
    wo = w_ref[0, :, off_wo:off_wo + H]                            # [H, H]  bf16
    w1 = w_ref[0, :, off_w1:off_w1 + F]                            # [H, F]  bf16
    w2 = w2_ref[0]                                                 # [F, H]  bf16
    bias = b_ref[0]                                                # [8, BW] f32
    bqkv = bias[0:1, 0:3 * H]
    bo = bias[1:2, 0:H]
    b1 = bias[2:3, 0:F]
    b2 = bias[3:4, 0:H]
    ln1g = bias[4:5, 0:H]
    ln1b = bias[5:6, 0:H]
    ln2g = bias[6:7, 0:H]
    ln2b = bias[7:8, 0:H]

    # ---- multi-head self-attention.
    # Single fused lane-dense QKV projection (1/sqrt(hd) folded into q third).
    qkv = jnp.dot(hb, wqkv, preferred_element_type=f32) + bqkv     # [R, 3H]

    def head3d(col_off):
        # static lane slice -> [bpb, N, hd]; the row split (b, n) is free.
        piece = qkv[:, col_off:col_off + hd]
        return piece.reshape(bpb, seq, hd).astype(bf16)

    ctx_heads = []
    for i in range(nh):                                            # static unroll
        qi = head3d(i * hd)
        ki = head3d(H + i * hd)
        vi = head3d(2 * H + i * hd)
        s = jnp.einsum('bnd,bmd->bnm', qi, ki,
                       preferred_element_type=f32)                 # [bpb, N, N]
        s = s - jnp.max(s, axis=-1, keepdims=True)
        p = jnp.exp(s)
        p = p * pl.reciprocal(jnp.sum(p, axis=-1, keepdims=True), approx=True)
        ci = jnp.einsum('bnm,bmd->bnd', p.astype(bf16), vi,
                        preferred_element_type=f32)                # [bpb, N, hd]
        ctx_heads.append(ci.reshape(R, hd))

    ctx2d = jnp.concatenate(ctx_heads, axis=-1)                    # [R, H]
    # single dense output projection (0.1 residual scale folded into wo/bo)
    attn = jnp.dot(ctx2d.astype(bf16), wo, preferred_element_type=f32) + bo

    # TODO(synk): dropout layers are identity (inference semantics).
    x1 = _layernorm(h + attn, ln1g, ln1b)

    # ---- feed-forward (0.1 residual scale folded into w2/b2).
    f1 = jnp.dot(x1.astype(bf16), w1, preferred_element_type=f32) + b1
    f1 = _gelu_exact(f1)
    f2 = jnp.dot(f1.astype(bf16), w2, preferred_element_type=f32) + b2
    x2 = _layernorm(x1 + f2, ln2g, ln2b)

    # carry to the next layer (skip the redundant store on the last layer)
    @pl.when(l < num_layers - 1)
    def _():
        h_scr[...] = x2

    # ---- epilogue: fc_out directly from x2 into the lane-dense output slab.
    @pl.when(l == num_layers - 1)
    def _():
        o_ref[...] = (jnp.dot(x2.astype(bf16), ow_ref[...],
                              preferred_element_type=f32) + ob_ref[...])


# --------------------------------- wrapper -----------------------------------

def equivariant_transformer(X, kp, *, num_heads, output_dim):
    B, N, Din = X.shape
    L = kp["w_slab"].shape[0]
    H = kp["emb_w"].shape[1]
    F = kp["w2"].shape[1]
    Wtot = kp["w_slab"].shape[2]
    BW = kp["bias"].shape[2]
    OutPad = kp["out_w"].shape[1]
    off_wo, off_w1, _, _ = _slab_offsets(H, F)

    # Row blocks: split rows at batch boundaries so attention stays per-batch.
    # G=2 feeds both TensorCores on v7x; weights still stream only G*L times.
    G = 2 if (B % 2 == 0 and B >= 2) else 1
    Bb = B // G
    R = Bb * N

    X2d = X.reshape(B * N, Din)

    in_specs = [
        pl.BlockSpec((R, Din), lambda g, l: (g, 0)),               # X rows
        pl.BlockSpec((Din, H), lambda g, l: (0, 0)),               # emb_w
        pl.BlockSpec((1, H), lambda g, l: (0, 0)),                 # emb_b
        pl.BlockSpec((1, H, Wtot), lambda g, l: (l, 0, 0)),        # wqkv|wo|w1
        pl.BlockSpec((1, F, H), lambda g, l: (l, 0, 0)),           # w2
        pl.BlockSpec((1, 8, BW), lambda g, l: (l, 0, 0)),          # biases + LN
        pl.BlockSpec((H, OutPad), lambda g, l: (0, 0)),            # fc_out w
        pl.BlockSpec((1, OutPad), lambda g, l: (0, 0)),            # fc_out b
    ]
    out_spec = pl.BlockSpec((R, OutPad), lambda g, l: (g, 0))

    # VMEM budget derived from the actual (double-buffered) block footprint.
    blk_bytes = (R * Din * 4 + Din * H * 2 + H * 4
                 + H * Wtot * 2 + F * H * 2 + 8 * BW * 4
                 + H * OutPad * 2 + OutPad * 4 + R * OutPad * 4)
    vmem_budget = max(4 * 1024 * 1024,
                      min(4 * (2 * blk_bytes + R * H * 4), 32 * 1024 * 1024))

    kern = functools.partial(fused_transformer_kernel,
                             num_heads=num_heads, num_layers=L,
                             bpb=Bb, seq=N, hidden=H, ff=F,
                             off_wo=off_wo, off_w1=off_w1)
    out_padded = pl.pallas_call(
        kern,
        out_shape=jax.ShapeDtypeStruct((B * N, OutPad), jnp.float32),
        grid=(G, L),
        in_specs=in_specs,
        out_specs=out_spec,
        scratch_shapes=[pltpu.VMEM((R, H), jnp.float32)],
        compiler_params=pltpu.CompilerParams(
            dimension_semantics=("parallel", "arbitrary"),
            vmem_limit_bytes=vmem_budget,
        ),
    )(X2d, kp["emb_w"], kp["emb_b"], kp["w_slab"], kp["w2"], kp["bias"],
      kp["out_w"], kp["out_b"])
    return out_padded.reshape(B, N, OutPad)[:, :, :output_dim]


# --------------------------- parameter init / packing --------------------------

def init_torch_params(key, input_dim, output_dim, hidden_dim, dim_feedforward,
                      num_layers):
    """PyTorch-layout parameters ([out, in] weights, packed in_proj qkv)."""
    def nrm(k, shape, scale=0.05):
        return scale * jax.random.normal(k, shape, jnp.float32)

    keys = jax.random.split(key, 2 + num_layers)
    H, F = hidden_dim, dim_feedforward
    layers = []
    for li in range(num_layers):
        lk = jax.random.split(keys[2 + li], 4)
        layers.append({
            "in_proj_w": nrm(lk[0], (3 * H, H)),          # rows: [q; k; v]
            "in_proj_b": jnp.zeros((3 * H,), jnp.float32),
            "out_proj_w": nrm(lk[1], (H, H)),
            "out_proj_b": jnp.zeros((H,), jnp.float32),
            "lin1_w": nrm(lk[2], (F, H)),
            "lin1_b": jnp.zeros((F,), jnp.float32),
            "lin2_w": nrm(lk[3], (H, F)),
            "lin2_b": jnp.zeros((H,), jnp.float32),
            "ln1_g": jnp.ones((H,), jnp.float32),
            "ln1_b": jnp.zeros((H,), jnp.float32),
            "ln2_g": jnp.ones((H,), jnp.float32),
            "ln2_b": jnp.zeros((H,), jnp.float32),
        })
    return {
        "emb_w": nrm(keys[0], (H, input_dim)),
        "emb_b": jnp.zeros((H,), jnp.float32),
        "out_w": nrm(keys[1], (output_dim, H)),
        "out_b": jnp.zeros((output_dim,), jnp.float32),
        "layers": layers,
    }


def pack_params(tp, num_heads):
    """PyTorch layout -> fused-kernel layout: [in, out] bf16 weights, static
       scales (1/sqrt(hd), 0.1 residual) folded in, per-layer params packed
       into 3 slabs (stacked over layers), fc_out padded to 128 lanes."""
    f32, bf16 = jnp.float32, jnp.bfloat16
    H = tp["emb_w"].shape[0]
    F = tp["layers"][0]["lin1_w"].shape[0]
    nh = num_heads
    hd = H // nh
    scale = 1.0 / math.sqrt(hd)
    off_wo, off_w1, w_tot, bias_w = _slab_offsets(H, F)

    w_slabs, w2s, biases = [], [], []
    for lp in tp["layers"]:
        wqkv = lp["in_proj_w"].T                          # [H, 3H], cols [q|k|v]
        wqkv = wqkv.at[:, :H].multiply(scale)
        wslab = jnp.zeros((H, w_tot), f32)
        wslab = wslab.at[:, 0:3 * H].set(wqkv)
        wslab = wslab.at[:, off_wo:off_wo + H].set(0.1 * lp["out_proj_w"].T)
        wslab = wslab.at[:, off_w1:off_w1 + F].set(lp["lin1_w"].T)
        w_slabs.append(wslab.astype(bf16))

        w2s.append((0.1 * lp["lin2_w"].T).astype(bf16))   # [F, H]

        bqkv = lp["in_proj_b"].at[:H].multiply(scale)
        bias = jnp.zeros((8, bias_w), f32)
        bias = bias.at[0, 0:3 * H].set(bqkv)
        bias = bias.at[1, 0:H].set(0.1 * lp["out_proj_b"])
        bias = bias.at[2, 0:F].set(lp["lin1_b"])
        bias = bias.at[3, 0:H].set(0.1 * lp["lin2_b"])
        bias = bias.at[4, 0:H].set(lp["ln1_g"])
        bias = bias.at[5, 0:H].set(lp["ln1_b"])
        bias = bias.at[6, 0:H].set(lp["ln2_g"])
        bias = bias.at[7, 0:H].set(lp["ln2_b"])
        biases.append(bias)

    out_dim = tp["out_w"].shape[0]
    out_pad = _ceil_to(out_dim, 128)
    ow = jnp.zeros((H, out_pad), f32).at[:, :out_dim].set(tp["out_w"].T)
    ob = jnp.zeros((1, out_pad), f32).at[0, :out_dim].set(tp["out_b"])

    packed = {
        "emb_w": tp["emb_w"].T.astype(bf16),              # [Din, H]
        "emb_b": tp["emb_b"].reshape(1, H).astype(f32),
        "w_slab": jnp.stack(w_slabs, axis=0),             # [L, H, Wtot]  bf16
        "w2": jnp.stack(w2s, axis=0),                     # [L, F, H]     bf16
        "bias": jnp.stack(biases, axis=0),                # [L, 8, BW]    f32
        "out_w": ow.astype(bf16),                         # [H, OutPad]   bf16
        "out_b": ob,                                      # [1, OutPad]   f32
    }
    return packed, out_dim


# ------------------------------------ main ------------------------------------

if __name__ == "__main__":
    B, N = 2, 8
    input_dim, output_dim = 4, 4
    hidden_dim, num_heads, num_layers, dim_feedforward = 32, 4, 2, 64

    key = jax.random.PRNGKey(0)
    k_param, k_x = jax.random.split(key)
    tparams = init_torch_params(k_param, input_dim, output_dim, hidden_dim,
                                dim_feedforward, num_layers)
    kparams, out_dim = pack_params(tparams, num_heads)
    X = jax.random.normal(k_x, (B, N, input_dim), jnp.float32)

    fwd = jax.jit(functools.partial(equivariant_transformer,
                                    num_heads=num_heads, output_dim=out_dim))
    out = fwd(X, kparams)
    out = jax.block_until_ready(out)
    assert out.shape == (B, N, output_dim)
    assert bool(jnp.all(jnp.isfinite(out)))
    print("KERNEL_OK")
</pallas_src>

<mosaic_0001>
module attributes {stable_mosaic.version = 11 : i64} {
  func.func @fused_transformer_kernel(%arg0: i32, %arg1: i32, %arg2: memref<8x4xf32, #tpu.memory_space<vmem>>, %arg3: memref<4x32xbf16, #tpu.memory_space<vmem>>, %arg4: memref<1x32xf32, #tpu.memory_space<vmem>>, %arg5: memref<1x32x384xbf16, #tpu.memory_space<vmem>>, %arg6: memref<1x64x32xbf16, #tpu.memory_space<vmem>>, %arg7: memref<1x8x128xf32, #tpu.memory_space<vmem>>, %arg8: memref<32x128xbf16, #tpu.memory_space<vmem>>, %arg9: memref<1x128xf32, #tpu.memory_space<vmem>>, %arg10: memref<8x128xf32, #tpu.memory_space<vmem>>, %arg11: memref<8x32xf32, #tpu.memory_space<vmem>>) attributes {dimension_semantics = [#tpu.dimension_semantics<parallel>, #tpu.dimension_semantics<arbitrary>], iteration_bounds = array<i64: 2, 2>, scalar_prefetch = 0 : i64, scratch_operands = 1 : i64, tpu.core_type = #tpu.core_type<tc>, window_params = [{transform_indices = @transform_0, window_bounds = array<i64: 8, 4>}, {pipeline_mode = #tpu.pipeline_mode<synchronous>, transform_indices = @transform_1, window_bounds = array<i64: 4, 32>}, {pipeline_mode = #tpu.pipeline_mode<synchronous>, transform_indices = @transform_2, window_bounds = array<i64: 1, 32>}, {transform_indices = @transform_3, window_bounds = array<i64: 1, 32, 384>}, {transform_indices = @transform_4, window_bounds = array<i64: 1, 64, 32>}, {transform_indices = @transform_5, window_bounds = array<i64: 1, 8, 128>}, {pipeline_mode = #tpu.pipeline_mode<synchronous>, transform_indices = @transform_6, window_bounds = array<i64: 32, 128>}, {pipeline_mode = #tpu.pipeline_mode<synchronous>, transform_indices = @transform_7, window_bounds = array<i64: 1, 128>}, {transform_indices = @transform_8, window_bounds = array<i64: 8, 128>}]} {
    %c0_i32 = arith.constant 0 : i32
    %0 = arith.cmpi eq, %arg1, %c0_i32 : i32
    %1 = arith.extui %0 : i1 to i32
    %c0_i32_0 = arith.constant 0 : i32
    %2 = arith.cmpi ne, %1, %c0_i32_0 : i32
    scf.if %2 {
      %c0_50 = arith.constant 0 : index
      %c0_51 = arith.constant 0 : index
      %187 = vector.load %arg2[%c0_50, %c0_51] : memref<8x4xf32, #tpu.memory_space<vmem>>, vector<8x4xf32>
      %188 = arith.truncf %187 : vector<8x4xf32> to vector<8x4xbf16>
      %c0_52 = arith.constant 0 : index
      %c0_53 = arith.constant 0 : index
      %189 = vector.load %arg3[%c0_52, %c0_53] : memref<4x32xbf16, #tpu.memory_space<vmem>>, vector<4x32xbf16>
      %cst_54 = arith.constant dense<0.000000e+00> : vector<8x32xf32>
      %190 = tpu.matmul %188, %189, %cst_54 {dimension_numbers = #tpu.dot_dimension_numbers<[1], [0], [0], [1], [0, 0, 1, 1], [], []>} : vector<8x4xbf16>, vector<4x32xbf16>, vector<8x32xf32> -> vector<8x32xf32>
      %c0_55 = arith.constant 0 : index
      %c0_56 = arith.constant 0 : index
      %191 = vector.load %arg4[%c0_55, %c0_56] : memref<1x32xf32, #tpu.memory_space<vmem>>, vector<1x32xf32>
      %192 = vector.broadcast %191 : vector<1x32xf32> to vector<8x32xf32>
      %193 = arith.addf %190, %192 : vector<8x32xf32>
      %c0_57 = arith.constant 0 : index
      %c0_58 = arith.constant 0 : index
      %194 = vector.load %arg11[%c0_57, %c0_58] : memref<8x32xf32, #tpu.memory_space<vmem>>, vector<8x32xf32>
      tpu.vector_store %arg11[%c0_57, %c0_58], %193 {strides = array<i32>} : memref<8x32xf32, #tpu.memory_space<vmem>>, vector<8x32xf32>,
    } else {
    }
    %c0 = arith.constant 0 : index
    %c0_1 = arith.constant 0 : index
    %3 = vector.load %arg11[%c0, %c0_1] : memref<8x32xf32, #tpu.memory_space<vmem>>, vector<8x32xf32>
    %4 = arith.truncf %3 : vector<8x32xf32> to vector<8x32xbf16>
    %c0_2 = arith.constant 0 : index
    %c0_3 = arith.constant 0 : index
    %c0_4 = arith.constant 0 : index
    %5 = vector.load %arg5[%c0_2, %c0_3, %c0_4] : memref<1x32x384xbf16, #tpu.memory_space<vmem>>, vector<1x32x96xbf16>
    %6 = vector.shape_cast %5 : vector<1x32x96xbf16> to vector<32x96xbf16>
    %c0_5 = arith.constant 0 : index
    %c0_6 = arith.constant 0 : index
    %c128 = arith.constant 128 : index
    %7 = vector.load %arg5[%c0_5, %c0_6, %c128] : memref<1x32x384xbf16, #tpu.memory_space<vmem>>, vector<1x32x32xbf16>
    %8 = vector.shape_cast %7 : vector<1x32x32xbf16> to vector<32x32xbf16>
    %c0_7 = arith.constant 0 : index
    %c0_8 = arith.constant 0 : index
    %c256 = arith.constant 256 : index
    %9 = vector.load %arg5[%c0_7, %c0_8, %c256] : memref<1x32x384xbf16, #tpu.memory_space<vmem>>, vector<1x32x64xbf16>
    %10 = vector.shape_cast %9 : vector<1x32x64xbf16> to vector<32x64xbf16>
    %c0_9 = arith.constant 0 : index
    %c0_10 = arith.constant 0 : index
    %c0_11 = arith.constant 0 : index
    %11 = vector.load %arg6[%c0_9, %c0_10, %c0_11] : memref<1x64x32xbf16, #tpu.memory_space<vmem>>, vector<1x64x32xbf16>
    %12 = vector.shape_cast %11 : vector<1x64x32xbf16> to vector<64x32xbf16>
    %c0_12 = arith.constant 0 : index
    %c0_13 = arith.constant 0 : index
    %c0_14 = arith.constant 0 : index
    %13 = vector.load %arg7[%c0_12, %c0_13, %c0_14] : memref<1x8x128xf32, #tpu.memory_space<vmem>>, vector<1x8x128xf32>
    %14 = vector.shape_cast %13 : vector<1x8x128xf32> to vector<8x128xf32>
    %15 = vector.extract_strided_slice %14 {offsets = [0, 0], sizes = [1, 96], strides = [1, 1]} : vector<8x128xf32> to vector<1x96xf32>
    %16 = vector.extract_strided_slice %14 {offsets = [1, 0], sizes = [1, 32], strides = [1, 1]} : vector<8x128xf32> to vector<1x32xf32>
    %17 = vector.extract_strided_slice %14 {offsets = [2, 0], sizes = [1, 64], strides = [1, 1]} : vector<8x128xf32> to vector<1x64xf32>
    %18 = vector.extract_strided_slice %14 {offsets = [3, 0], sizes = [1, 32], strides = [1, 1]} : vector<8x128xf32> to vector<1x32xf32>
    %19 = vector.extract_strided_slice %14 {offsets = [4, 0], sizes = [1, 32], strides = [1, 1]} : vector<8x128xf32> to vector<1x32xf32>
    %20 = vector.extract_strided_slice %14 {offsets = [5, 0], sizes = [1, 32], strides = [1, 1]} : vector<8x128xf32> to vector<1x32xf32>
    %21 = vector.extract_strided_slice %14 {offsets = [6, 0], sizes = [1, 32], strides = [1, 1]} : vector<8x128xf32> to vector<1x32xf32>
    %22 = vector.extract_strided_slice %14 {offsets = [7, 0], sizes = [1, 32], strides = [1, 1]} : vector<8x128xf32> to vector<1x32xf32>
    %cst = arith.constant dense<0.000000e+00> : vector<8x96xf32>
    %23 = tpu.matmul %4, %6, %cst {dimension_numbers = #tpu.dot_dimension_numbers<[1], [0], [0], [1], [0, 0, 1, 1], [], []>} : vector<8x32xbf16>, vector<32x96xbf16>, vector<8x96xf32> -> vector<8x96xf32>
    %24 = vector.broadcast %15 : vector<1x96xf32> to vector<8x96xf32>
    %25 = arith.addf %23, %24 : vector<8x96xf32>
    %26 = vector.extract_strided_slice %25 {offsets = [0, 0], sizes = [8, 8], strides = [1, 1]} : vector<8x96xf32> to vector<8x8xf32>
    %27 = vector.shape_cast %26 : vector<8x8xf32> to vector<1x8x8xf32>
    %28 = arith.truncf %27 : vector<1x8x8xf32> to vector<1x8x8xbf16>
    %29 = vector.extract_strided_slice %25 {offsets = [0, 32], sizes = [8, 8], strides = [1, 1]} : vector<8x96xf32> to vector<8x8xf32>
    %30 = vector.shape_cast %29 : vector<8x8xf32> to vector<1x8x8xf32>
    %31 = arith.truncf %30 : vector<1x8x8xf32> to vector<1x8x8xbf16>
    %32 = vector.extract_strided_slice %25 {offsets = [0, 64], sizes = [8, 8], strides = [1, 1]} : vector<8x96xf32> to vector<8x8xf32>
    %33 = vector.shape_cast %32 : vector<8x8xf32> to vector<1x8x8xf32>
    %34 = arith.truncf %33 : vector<1x8x8xf32> to vector<1x8x8xbf16>
    "tpu.trace_start"() <{level = 10 : i32, message = "bnd,bmd->bnm"}> : () -> ()
    %cst_15 = arith.constant dense<0.000000e+00> : vector<1x8x8xf32>
    %35 = tpu.matmul %28, %31, %cst_15 {dimension_numbers = #tpu.dot_dimension_numbers<[2], [2], [1], [1], [0, 0, 0, 1, 1, 1], [0], [0]>} : vector<1x8x8xbf16>, vector<1x8x8xbf16>, vector<1x8x8xf32> -> vector<1x8x8xf32>
    "tpu.trace_stop"() : () -> ()
    %cst_16 = arith.constant dense<0xFF800000> : vector<1x8xf32>
    %36 = vector.multi_reduction <maximumf>, %35, %cst_16 [2] : vector<1x8x8xf32> to vector<1x8xf32>
    %37 = vector.shape_cast %36 : vector<1x8xf32> to vector<1x8x1xf32>
    %38 = vector.broadcast %37 : vector<1x8x1xf32> to vector<1x8x8xf32>
    %39 = arith.subf %35, %38 : vector<1x8x8xf32>
    %40 = math.exp %39 : vector<1x8x8xf32>
    %cst_17 = arith.constant dense<0.000000e+00> : vector<1x8xf32>
    %41 = vector.multi_reduction <add>, %40, %cst_17 [2] : vector<1x8x8xf32> to vector<1x8xf32>
    %42 = vector.shape_cast %41 : vector<1x8xf32> to vector<1x8x1xf32>
    %43 = tpu.reciprocal %42 {approx = true} : vector<1x8x1xf32> -> vector<1x8x1xf32>
    %44 = vector.broadcast %43 : vector<1x8x1xf32> to vector<1x8x8xf32>
    %45 = arith.mulf %40, %44 : vector<1x8x8xf32>
    %46 = arith.truncf %45 : vector<1x8x8xf32> to vector<1x8x8xbf16>
    "tpu.trace_start"() <{level = 10 : i32, message = "bnm,bmd->bnd"}> : () -> ()
    %cst_18 = arith.constant dense<0.000000e+00> : vector<1x8x8xf32>
    %47 = tpu.matmul %46, %34, %cst_18 {dimension_numbers = #tpu.dot_dimension_numbers<[2], [1], [1], [2], [0, 0, 0, 1, 1, 2], [0], [0]>} : vector<1x8x8xbf16>, vector<1x8x8xbf16>, vector<1x8x8xf32> -> vector<1x8x8xf32>
    "tpu.trace_stop"() : () -> ()
    %48 = vector.shape_cast %47 : vector<1x8x8xf32> to vector<8x8xf32>
    %49 = vector.extract_strided_slice %25 {offsets = [0, 8], sizes = [8, 8], strides = [1, 1]} : vector<8x96xf32> to vector<8x8xf32>
    %50 = vector.shape_cast %49 : vector<8x8xf32> to vector<1x8x8xf32>
    %51 = arith.truncf %50 : vector<1x8x8xf32> to vector<1x8x8xbf16>
    %52 = vector.extract_strided_slice %25 {offsets = [0, 40], sizes = [8, 8], strides = [1, 1]} : vector<8x96xf32> to vector<8x8xf32>
    %53 = vector.shape_cast %52 : vector<8x8xf32> to vector<1x8x8xf32>
    %54 = arith.truncf %53 : vector<1x8x8xf32> to vector<1x8x8xbf16>
    %55 = vector.extract_strided_slice %25 {offsets = [0, 72], sizes = [8, 8], strides = [1, 1]} : vector<8x96xf32> to vector<8x8xf32>
    %56 = vector.shape_cast %55 : vector<8x8xf32> to vector<1x8x8xf32>
    %57 = arith.truncf %56 : vector<1x8x8xf32> to vector<1x8x8xbf16>
    "tpu.trace_start"() <{level = 10 : i32, message = "bnd,bmd->bnm"}> : () -> ()
    %cst_19 = arith.constant dense<0.000000e+00> : vector<1x8x8xf32>
    %58 = tpu.matmul %51, %54, %cst_19 {dimension_numbers = #tpu.dot_dimension_numbers<[2], [2], [1], [1], [0, 0, 0, 1, 1, 1], [0], [0]>} : vector<1x8x8xbf16>, vector<1x8x8xbf16>, vector<1x8x8xf32> -> vector<1x8x8xf32>
    "tpu.trace_stop"() : () -> ()
    %cst_20 = arith.constant dense<0xFF800000> : vector<1x8xf32>
    %59 = vector.multi_reduction <maximumf>, %58, %cst_20 [2] : vector<1x8x8xf32> to vector<1x8xf32>
    %60 = vector.shape_cast %59 : vector<1x8xf32> to vector<1x8x1xf32>
    %61 = vector.broadcast %60 : vector<1x8x1xf32> to vector<1x8x8xf32>
    %62 = arith.subf %58, %61 : vector<1x8x8xf32>
    %63 = math.exp %62 : vector<1x8x8xf32>
    %cst_21 = arith.constant dense<0.000000e+00> : vector<1x8xf32>
    %64 = vector.multi_reduction <add>, %63, %cst_21 [2] : vector<1x8x8xf32> to vector<1x8xf32>
    %65 = vector.shape_cast %64 : vector<1x8xf32> to vector<1x8x1xf32>
    %66 = tpu.reciprocal %65 {approx = true} : vector<1x8x1xf32> -> vector<1x8x1xf32>
    %67 = vector.broadcast %66 : vector<1x8x1xf32> to vector<1x8x8xf32>
    %68 = arith.mulf %63, %67 : vector<1x8x8xf32>
    %69 = arith.truncf %68 : vector<1x8x8xf32> to vector<1x8x8xbf16>
    "tpu.trace_start"() <{level = 10 : i32, message = "bnm,bmd->bnd"}> : () -> ()
    %cst_22 = arith.constant dense<0.000000e+00> : vector<1x8x8xf32>
    %70 = tpu.matmul %69, %57, %cst_22 {dimension_numbers = #tpu.dot_dimension_numbers<[2], [1], [1], [2], [0, 0, 0, 1, 1, 2], [0], [0]>} : vector<1x8x8xbf16>, vector<1x8x8xbf16>, vector<1x8x8xf32> -> vector<1x8x8xf32>
    "tpu.trace_stop"() : () -> ()
    %71 = vector.shape_cast %70 : vector<1x8x8xf32> to vector<8x8xf32>
    %72 = vector.extract_strided_slice %25 {offsets = [0, 16], sizes = [8, 8], strides = [1, 1]} : vector<8x96xf32> to vector<8x8xf32>
    %73 = vector.shape_cast %72 : vector<8x8xf32> to vector<1x8x8xf32>
    %74 = arith.truncf %73 : vector<1x8x8xf32> to vector<1x8x8xbf16>
    %75 = vector.extract_strided_slice %25 {offsets = [0, 48], sizes = [8, 8], strides = [1, 1]} : vector<8x96xf32> to vector<8x8xf32>
    %76 = vector.shape_cast %75 : vector<8x8xf32> to vector<1x8x8xf32>
    %77 = arith.truncf %76 : vector<1x8x8xf32> to vector<1x8x8xbf16>
    %78 = vector.extract_strided_slice %25 {offsets = [0, 80], sizes = [8, 8], strides = [1, 1]} : vector<8x96xf32> to vector<8x8xf32>
    %79 = vector.shape_cast %78 : vector<8x8xf32> to vector<1x8x8xf32>
    %80 = arith.truncf %79 : vector<1x8x8xf32> to vector<1x8x8xbf16>
    "tpu.trace_start"() <{level = 10 : i32, message = "bnd,bmd->bnm"}> : () -> ()
    %cst_23 = arith.constant dense<0.000000e+00> : vector<1x8x8xf32>
    %81 = tpu.matmul %74, %77, %cst_23 {dimension_numbers = #tpu.dot_dimension_numbers<[2], [2], [1], [1], [0, 0, 0, 1, 1, 1], [0], [0]>} : vector<1x8x8xbf16>, vector<1x8x8xbf16>, vector<1x8x8xf32> -> vector<1x8x8xf32>
    "tpu.trace_stop"() : () -> ()
    %cst_24 = arith.constant dense<0xFF800000> : vector<1x8xf32>
    %82 = vector.multi_reduction <maximumf>, %81, %cst_24 [2] : vector<1x8x8xf32> to vector<1x8xf32>
    %83 = vector.shape_cast %82 : vector<1x8xf32> to vector<1x8x1xf32>
    %84 = vector.broadcast %83 : vector<1x8x1xf32> to vector<1x8x8xf32>
    %85 = arith.subf %81, %84 : vector<1x8x8xf32>
    %86 = math.exp %85 : vector<1x8x8xf32>
    %cst_25 = arith.constant dense<0.000000e+00> : vector<1x8xf32>
    %87 = vector.multi_reduction <add>, %86, %cst_25 [2] : vector<1x8x8xf32> to vector<1x8xf32>
    %88 = vector.shape_cast %87 : vector<1x8xf32> to vector<1x8x1xf32>
    %89 = tpu.reciprocal %88 {approx = true} : vector<1x8x1xf32> -> vector<1x8x1xf32>
    %90 = vector.broadcast %89 : vector<1x8x1xf32> to vector<1x8x8xf32>
    %91 = arith.mulf %86, %90 : vector<1x8x8xf32>
    %92 = arith.truncf %91 : vector<1x8x8xf32> to vector<1x8x8xbf16>
    "tpu.trace_start"() <{level = 10 : i32, message = "bnm,bmd->bnd"}> : () -> ()
    %cst_26 = arith.constant dense<0.000000e+00> : vector<1x8x8xf32>
    %93 = tpu.matmul %92, %80, %cst_26 {dimension_numbers = #tpu.dot_dimension_numbers<[2], [1], [1], [2], [0, 0, 0, 1, 1, 2], [0], [0]>} : vector<1x8x8xbf16>, vector<1x8x8xbf16>, vector<1x8x8xf32> -> vector<1x8x8xf32>
    "tpu.trace_stop"() : () -> ()
    %94 = vector.shape_cast %93 : vector<1x8x8xf32> to vector<8x8xf32>
    %95 = vector.extract_strided_slice %25 {offsets = [0, 24], sizes = [8, 8], strides = [1, 1]} : vector<8x96xf32> to vector<8x8xf32>
    %96 = vector.shape_cast %95 : vector<8x8xf32> to vector<1x8x8xf32>
    %97 = arith.truncf %96 : vector<1x8x8xf32> to vector<1x8x8xbf16>
    %98 = vector.extract_strided_slice %25 {offsets = [0, 56], sizes = [8, 8], strides = [1, 1]} : vector<8x96xf32> to vector<8x8xf32>
    %99 = vector.shape_cast %98 : vector<8x8xf32> to vector<1x8x8xf32>
    %100 = arith.truncf %99 : vector<1x8x8xf32> to vector<1x8x8xbf16>
    %101 = vector.extract_strided_slice %25 {offsets = [0, 88], sizes = [8, 8], strides = [1, 1]} : vector<8x96xf32> to vector<8x8xf32>
    %102 = vector.shape_cast %101 : vector<8x8xf32> to vector<1x8x8xf32>
    %103 = arith.truncf %102 : vector<1x8x8xf32> to vector<1x8x8xbf16>
    "tpu.trace_start"() <{level = 10 : i32, message = "bnd,bmd->bnm"}> : () -> ()
    %cst_27 = arith.constant dense<0.000000e+00> : vector<1x8x8xf32>
    %104 = tpu.matmul %97, %100, %cst_27 {dimension_numbers = #tpu.dot_dimension_numbers<[2], [2], [1], [1], [0, 0, 0, 1, 1, 1], [0], [0]>} : vector<1x8x8xbf16>, vector<1x8x8xbf16>, vector<1x8x8xf32> -> vector<1x8x8xf32>
    "tpu.trace_stop"() : () -> ()
    %cst_28 = arith.constant dense<0xFF800000> : vector<1x8xf32>
    %105 = vector.multi_reduction <maximumf>, %104, %cst_28 [2] : vector<1x8x8xf32> to vector<1x8xf32>
    %106 = vector.shape_cast %105 : vector<1x8xf32> to vector<1x8x1xf32>
    %107 = vector.broadcast %106 : vector<1x8x1xf32> to vector<1x8x8xf32>
    %108 = arith.subf %104, %107 : vector<1x8x8xf32>
    %109 = math.exp %108 : vector<1x8x8xf32>
    %cst_29 = arith.constant dense<0.000000e+00> : vector<1x8xf32>
    %110 = vector.multi_reduction <add>, %109, %cst_29 [2] : vector<1x8x8xf32> to vector<1x8xf32>
    %111 = vector.shape_cast %110 : vector<1x8xf32> to vector<1x8x1xf32>
    %112 = tpu.reciprocal %111 {approx = true} : vector<1x8x1xf32> -> vector<1x8x1xf32>
    %113 = vector.broadcast %112 : vector<1x8x1xf32> to vector<1x8x8xf32>
    %114 = arith.mulf %109, %113 : vector<1x8x8xf32>
    %115 = arith.truncf %114 : vector<1x8x8xf32> to vector<1x8x8xbf16>
    "tpu.trace_start"() <{level = 10 : i32, message = "bnm,bmd->bnd"}> : () -> ()
    %cst_30 = arith.constant dense<0.000000e+00> : vector<1x8x8xf32>
    %116 = tpu.matmul %115, %103, %cst_30 {dimension_numbers = #tpu.dot_dimension_numbers<[2], [1], [1], [2], [0, 0, 0, 1, 1, 2], [0], [0]>} : vector<1x8x8xbf16>, vector<1x8x8xbf16>, vector<1x8x8xf32> -> vector<1x8x8xf32>
    "tpu.trace_stop"() : () -> ()
    %117 = vector.shape_cast %116 : vector<1x8x8xf32> to vector<8x8xf32>
    %118 = tpu.concatenate %48, %71, %94, %117 in 1 : vector<8x8xf32>, vector<8x8xf32>, vector<8x8xf32>, vector<8x8xf32> -> vector<8x32xf32>
    %119 = arith.truncf %118 : vector<8x32xf32> to vector<8x32xbf16>
    %cst_31 = arith.constant dense<0.000000e+00> : vector<8x32xf32>
    %120 = tpu.matmul %119, %8, %cst_31 {dimension_numbers = #tpu.dot_dimension_numbers<[1], [0], [0], [1], [0, 0, 1, 1], [], []>} : vector<8x32xbf16>, vector<32x32xbf16>, vector<8x32xf32> -> vector<8x32xf32>
    %121 = vector.broadcast %16 : vector<1x32xf32> to vector<8x32xf32>
    %122 = arith.addf %120, %121 : vector<8x32xf32>
    %123 = arith.addf %3, %122 : vector<8x32xf32>
    %cst_32 = arith.constant dense<0.000000e+00> : vector<8xf32>
    %124 = vector.multi_reduction <add>, %123, %cst_32 [1] : vector<8x32xf32> to vector<8xf32>
    %125 = vector.shape_cast %124 : vector<8xf32> to vector<8x1xf32>
    %cst_33 = arith.constant 3.200000e+01 : f32
    %126 = vector.broadcast %cst_33 : f32 to vector<8x1xf32>
    %127 = arith.divf %125, %126 : vector<8x1xf32>
    %128 = vector.broadcast %127 : vector<8x1xf32> to vector<8x32xf32>
    %129 = arith.subf %123, %128 : vector<8x32xf32>
    %130 = arith.mulf %129, %129 : vector<8x32xf32>
    %cst_34 = arith.constant dense<0.000000e+00> : vector<8xf32>
    %131 = vector.multi_reduction <add>, %130, %cst_34 [1] : vector<8x32xf32> to vector<8xf32>
    %132 = vector.shape_cast %131 : vector<8xf32> to vector<8x1xf32>
    %cst_35 = arith.constant 3.200000e+01 : f32
    %133 = vector.broadcast %cst_35 : f32 to vector<8x1xf32>
    %134 = arith.divf %132, %133 : vector<8x1xf32>
    %cst_36 = arith.constant 9.99999997E-7 : f32
    %135 = vector.broadcast %cst_36 : f32 to vector<8x1xf32>
    %136 = arith.addf %134, %135 : vector<8x1xf32>
    %137 = math.rsqrt %136 : vector<8x1xf32>
    %138 = vector.broadcast %137 : vector<8x1xf32> to vector<8x32xf32>
    %139 = arith.mulf %129, %138 : vector<8x32xf32>
    %140 = vector.broadcast %19 : vector<1x32xf32> to vector<8x32xf32>
    %141 = arith.mulf %139, %140 : vector<8x32xf32>
    %142 = vector.broadcast %20 : vector<1x32xf32> to vector<8x32xf32>
    %143 = arith.addf %141, %142 : vector<8x32xf32>
    %144 = arith.truncf %143 : vector<8x32xf32> to vector<8x32xbf16>
    %cst_37 = arith.constant dense<0.000000e+00> : vector<8x64xf32>
    %145 = tpu.matmul %144, %10, %cst_37 {dimension_numbers = #tpu.dot_dimension_numbers<[1], [0], [0], [1], [0, 0, 1, 1], [], []>} : vector<8x32xbf16>, vector<32x64xbf16>, vector<8x64xf32> -> vector<8x64xf32>
    %146 = vector.broadcast %17 : vector<1x64xf32> to vector<8x64xf32>
    %147 = arith.addf %145, %146 : vector<8x64xf32>
    %cst_38 = arith.constant 5.000000e-01 : f32
    %148 = vector.broadcast %cst_38 : f32 to vector<8x64xf32>
    %149 = arith.mulf %148, %147 : vector<8x64xf32>
    %cst_39 = arith.constant 0.707106769 : f32
    %150 = vector.broadcast %cst_39 : f32 to vector<8x64xf32>
    %151 = arith.mulf %147, %150 : vector<8x64xf32>
    %152 = math.erf %151 : vector<8x64xf32>
    %cst_40 = arith.constant 1.000000e+00 : f32
    %153 = vector.broadcast %cst_40 : f32 to vector<8x64xf32>
    %154 = arith.addf %153, %152 : vector<8x64xf32>
    %155 = arith.mulf %149, %154 : vector<8x64xf32>
    %156 = arith.truncf %155 : vector<8x64xf32> to vector<8x64xbf16>
    %cst_41 = arith.constant dense<0.000000e+00> : vector<8x32xf32>
    %157 = tpu.matmul %156, %12, %cst_41 {dimension_numbers = #tpu.dot_dimension_numbers<[1], [0], [0], [1], [0, 0, 1, 1], [], []>} : vector<8x64xbf16>, vector<64x32xbf16>, vector<8x32xf32> -> vector<8x32xf32>
    %158 = vector.broadcast %18 : vector<1x32xf32> to vector<8x32xf32>
    %159 = arith.addf %157, %158 : vector<8x32xf32>
    %160 = arith.addf %143, %159 : vector<8x32xf32>
    %cst_42 = arith.constant dense<0.000000e+00> : vector<8xf32>
    %161 = vector.multi_reduction <add>, %160, %cst_42 [1] : vector<8x32xf32> to vector<8xf32>
    %162 = vector.shape_cast %161 : vector<8xf32> to vector<8x1xf32>
    %cst_43 = arith.constant 3.200000e+01 : f32
    %163 = vector.broadcast %cst_43 : f32 to vector<8x1xf32>
    %164 = arith.divf %162, %163 : vector<8x1xf32>
    %165 = vector.broadcast %164 : vector<8x1xf32> to vector<8x32xf32>
    %166 = arith.subf %160, %165 : vector<8x32xf32>
    %167 = arith.mulf %166, %166 : vector<8x32xf32>
    %cst_44 = arith.constant dense<0.000000e+00> : vector<8xf32>
    %168 = vector.multi_reduction <add>, %167, %cst_44 [1] : vector<8x32xf32> to vector<8xf32>
    %169 = vector.shape_cast %168 : vector<8xf32> to vector<8x1xf32>
    %cst_45 = arith.constant 3.200000e+01 : f32
    %170 = vector.broadcast %cst_45 : f32 to vector<8x1xf32>
    %171 = arith.divf %169, %170 : vector<8x1xf32>
    %cst_46 = arith.constant 9.99999997E-7 : f32
    %172 = vector.broadcast %cst_46 : f32 to vector<8x1xf32>
    %173 = arith.addf %171, %172 : vector<8x1xf32>
    %174 = math.rsqrt %173 : vector<8x1xf32>
    %175 = vector.broadcast %174 : vector<8x1xf32> to vector<8x32xf32>
    %176 = arith.mulf %166, %175 : vector<8x32xf32>
    %177 = vector.broadcast %21 : vector<1x32xf32> to vector<8x32xf32>
    %178 = arith.mulf %176, %177 : vector<8x32xf32>
    %179 = vector.broadcast %22 : vector<1x32xf32> to vector<8x32xf32>
    %180 = arith.addf %178, %179 : vector<8x32xf32>
    %c1_i32 = arith.constant 1 : i32
    %181 = arith.cmpi slt, %arg1, %c1_i32 : i32
    %182 = arith.extui %181 : i1 to i32
    %c0_i32_47 = arith.constant 0 : i32
    %183 = arith.cmpi ne, %182, %c0_i32_47 : i32
    scf.if %183 {
      %c0_50 = arith.constant 0 : index
      %c0_51 = arith.constant 0 : index
      %187 = vector.load %arg11[%c0_50, %c0_51] : memref<8x32xf32, #tpu.memory_space<vmem>>, vector<8x32xf32>
      tpu.vector_store %arg11[%c0_50, %c0_51], %180 {strides = array<i32>} : memref<8x32xf32, #tpu.memory_space<vmem>>, vector<8x32xf32>,
    } else {
    }
    %c1_i32_48 = arith.constant 1 : i32
    %184 = arith.cmpi eq, %arg1, %c1_i32_48 : i32
    %185 = arith.extui %184 : i1 to i32
    %c0_i32_49 = arith.constant 0 : i32
    %186 = arith.cmpi ne, %185, %c0_i32_49 : i32
    scf.if %186 {
      %187 = arith.truncf %180 : vector<8x32xf32> to vector<8x32xbf16>
      %c0_50 = arith.constant 0 : index
      %c0_51 = arith.constant 0 : index
      %188 = vector.load %arg8[%c0_50, %c0_51] : memref<32x128xbf16, #tpu.memory_space<vmem>>, vector<32x128xbf16>
      %cst_52 = arith.constant dense<0.000000e+00> : vector<8x128xf32>
      %189 = tpu.matmul %187, %188, %cst_52 {dimension_numbers = #tpu.dot_dimension_numbers<[1], [0], [0], [1], [0, 0, 1, 1], [], []>} : vector<8x32xbf16>, vector<32x128xbf16>, vector<8x128xf32> -> vector<8x128xf32>
      %c0_53 = arith.constant 0 : index
      %c0_54 = arith.constant 0 : index
      %190 = vector.load %arg9[%c0_53, %c0_54] : memref<1x128xf32, #tpu.memory_space<vmem>>, vector<1x128xf32>
      %191 = vector.broadcast %190 : vector<1x128xf32> to vector<8x128xf32>
      %192 = arith.addf %189, %191 : vector<8x128xf32>
      %c0_55 = arith.constant 0 : index
      %c0_56 = arith.constant 0 : index
      %193 = vector.load %arg10[%c0_55, %c0_56] : memref<8x128xf32, #tpu.memory_space<vmem>>, vector<8x128xf32>
      tpu.vector_store %arg10[%c0_55, %c0_56], %192 {strides = array<i32>} : memref<8x128xf32, #tpu.memory_space<vmem>>, vector<8x128xf32>,
    } else {
    }
    return
  }
  func.func @transform_0(%arg0: i32, %arg1: i32) -> (i32, i32) {
    %c0_i32 = arith.constant 0 : i32
    %c0_i32_0 = arith.constant 0 : i32
    return %arg0, %c0_i32 : i32, i32
  }
  func.func @transform_1(%arg0: i32, %arg1: i32) -> (i32, i32) {
    %c0_i32 = arith.constant 0 : i32
    %c0_i32_0 = arith.constant 0 : i32
    %c0_i32_1 = arith.constant 0 : i32
    return %c0_i32, %c0_i32_0 : i32, i32
  }
  func.func @transform_2(%arg0: i32, %arg1: i32) -> (i32, i32) {
    %c0_i32 = arith.constant 0 : i32
    %c0_i32_0 = arith.constant 0 : i32
    %c0_i32_1 = arith.constant 0 : i32
    return %c0_i32, %c0_i32_0 : i32, i32
  }
  func.func @transform_3(%arg0: i32, %arg1: i32) -> (i32, i32, i32) {
    %c0_i32 = arith.constant 0 : i32
    %c0_i32_0 = arith.constant 0 : i32
    %c0_i32_1 = arith.constant 0 : i32
    return %arg1, %c0_i32, %c0_i32_0 : i32, i32, i32
  }
  func.func @transform_4(%arg0: i32, %arg1: i32) -> (i32, i32, i32) {
    %c0_i32 = arith.constant 0 : i32
    %c0_i32_0 = arith.constant 0 : i32
    %c0_i32_1 = arith.constant 0 : i32
    return %arg1, %c0_i32, %c0_i32_0 : i32, i32, i32
  }
  func.func @transform_5(%arg0: i32, %arg1: i32) -> (i32, i32, i32) {
    %c0_i32 = arith.constant 0 : i32
    %c0_i32_0 = arith.constant 0 : i32
    %c0_i32_1 = arith.constant 0 : i32
    return %arg1, %c0_i32, %c0_i32_0 : i32, i32, i32
  }
  func.func @transform_6(%arg0: i32, %arg1: i32) -> (i32, i32) {
    %c0_i32 = arith.constant 0 : i32
    %c0_i32_0 = arith.constant 0 : i32
    %c0_i32_1 = arith.constant 0 : i32
    return %c0_i32, %c0_i32_0 : i32, i32
  }
  func.func @transform_7(%arg0: i32, %arg1: i32) -> (i32, i32) {
    %c0_i32 = arith.constant 0 : i32
    %c0_i32_0 = arith.constant 0 : i32
    %c0_i32_1 = arith.constant 0 : i32
    return %c0_i32, %c0_i32_0 : i32, i32
  }
  func.func @transform_8(%arg0: i32, %arg1: i32) -> (i32, i32) {
    %c0_i32 = arith.constant 0 : i32
    %c0_i32_0 = arith.constant 0 : i32
    return %arg0, %c0_i32 : i32, i32
  }
}

</mosaic_0001>

<bundles_post_ra>
// kernel: equivariant_transformer.1
= control target key start
LH: loop header
LB: loop body
LE: loop exit
PB: predicated region body
PF: predicated region fallthrough
CT: control target
= control target key end

     0   :  { %s1779_s27 = smov 0   ;;  %s1781_s28 = smov 0   ;;  %s1996_s0 = inlined_call_operand.vmem [shape: f32[16,4], index: 0, kind: input, shape index: {}]   ;;  %s1997_s1 = inlined_call_operand.vmem [shape: bf16[4,32], index: 1, kind: input, shape index: {}]   ;;  %s1998_s2 = inlined_call_operand.vmem [shape: f32[1,32], index: 2, kind: input, shape index: {}]   ;;  %s1999_s3 = inlined_call_operand.vmem [shape: bf16[2,32,384], index: 3, kind: input, shape index: {}]   ;;  %s2000_s4 = inlined_call_operand.vmem [shape: bf16[2,64,32], index: 4, kind: input, shape index: {}]   ;;  %s2001_s5 = inlined_call_operand.vmem [shape: f32[2,8,128], index: 5, kind: input, shape index: {}]   ;;  %s2002_s6 = inlined_call_operand.vmem [shape: bf16[32,128], index: 6, kind: input, shape index: {}]   ;;  %s2003_s7 = inlined_call_operand.vmem [shape: f32[1,128], index: 7, kind: input, shape index: {}]   ;;  %s2004_s8 = inlined_call_operand.vmem [shape: f32[16,128], index: 8, kind: output, shape index: {}]  }
   0x1   :  { %2005 = sst [smem:[#allocation4_spill]] %s1996_s0  ;;  %s1783_s29 = smov 0  }
   0x2   :  { %s1785_s30 = smov 0   ;;  %s1787_s9 = smov 0  }
   0x3 LB: > { %s27_s10 = sadd.s32 1, %s1704_s29  ;;  %s30_s11 = sadd.s32 1, %s1708_s30  ;;  %s1712_s9 = sphi %s1787_s9, %s18_s9   ;;  %s1708_s30 = sphi %s1785_s30, %s2012_s30   ;;  %s1704_s29 = sphi %s1783_s29, %s2011_s29   ;;  %s1700_s28 = sphi %s1781_s28, %s2010_s28   ;;  %s1696_s27 = sphi %s1779_s27, %s2009_s27  }
   0x4   : > { %p28_p0 = scmp.ge.s32.totalorder %s27_s10, 2  ;;  %p1405_p1 = scmp.ge.s32.totalorder %s1712_s9, 1 }
   0x5   : > { %p302_p2 = scmp.lt.s32.totalorder %s1712_s9, 5 }
   0x6   : > { %s2014_s10 = smov (%p28_p0, %s27_s10), 0  ;;  %s2016_s11 = smov (!%p28_p0, %s30_s11), %s1708_s30 }
   0x7   : > { %p303_p3 = pnand %p1405_p1, %p302_p2  ;;  %p32_p4 = scmp.ge.s32.totalorder %s2016_s11, 2 }
   0x8   : > { %p348_p5 = scmp.lt.s32.totalorder (!%p303_p3), %s1700_s28, 1  ;;  %p352_p6 = scmp.lt.s32.totalorder (!%p303_p3), %s1696_s27, 1 }
   0x9   : > { %s2018_s11 = smov (%p32_p4, %s2016_s11), 0  ;;  %306 = sbr.rel (%p303_p3) target bundleno = 2879 (0xb3f), region = 52 }
   0xa   : > { %2006 = sst [smem:[#allocation3_spill]] %s2018_s11  ;;  %p1412_p7 = scmp.ne.s32.totalorder (!%p303_p3), %s1696_s27, 0 }
   0xb   : > { %s2007_s0 = sld [smem:[#allocation4_spill]] (!%p303_p3) }
   0xe   : > { %s2020_s28 = smov (!%p348_p5, %s1700_s28), 1 }
   0xf   : > { %s353_s12 = scalar_select %p352_p6, %s1696_s27, 1 }
  0x10   : > { %s1406_s13 = sshll.u32 %s2020_s28, 3  ;;  %374 = sbr.rel (%p1412_p7) target bundleno = 225 (0xe1), region = 56 }
  0x11   : > { %s351_s16 = scalar_lea.vmem %s2007_s0, %s1406_s13  ;;  %s1579_s17 = smul.u32 48, %s353_s12 }
  0x12   : > { %s1445_s18 = sshll.u32 %s353_s12, 5  ;;  %s1410_s19 = sshll.u32 %s353_s12, 3 }
  0x13   : > { %s1819_s22 = scalar_lea.vmem %s1999_s3, %s1579_s17  ;;  %s1824_s25 = scalar_lea.vmem %s2000_s4, %s1445_s18 }
  0x14   : > { %s1829_s28 = scalar_lea.vmem %s2001_s5, %s1410_s19  ;;  %s1834_s0 = scalar_lea.vmem %s2004_s8, %s1406_s13 }
  0x15   : > { %v377_v0 = vld [vmem:[%s1997_s1] sm:$0x3]  ;;  %vm389_vm0 = vcmask 1041408   ;;  %v1714_v2 = vmov 0.0   ;;  %vm1715_vm1 = vmmov 0   ;;  %vm385_vm2 = vcmask 31744  }
  0x16   : > { %v375_v1 = vld [vmem:[%s351_s16] sm:$0xff]  ;;  %1481 = vmatprep.subr.bf16.mxu0 %v1714_v2  ;;  %v391_v3 = vsel %vm389_vm0, %v377_v0, 0  ;;  %1483 = vmatprep.mubr.msk.bf16.mxu0 %vm1715_vm1, %v1714_v2  ;;  %vm433_vm3 = vcmask 261120  }
  0x17   : > { %v376_v4 = vpack.c.bf16 %v375_v1, %v375_v1  ;;  %1482 = vmatpush3.bf16.msra.mxu0 %v391_v3  ;;  %v1413_v5 = vld [vmem:[%s1998_s2] ss:$0 sm:$0xff] }
  0x1a   : > { %1484 = vmatmul.mubr.msk.bf16.vlgmr.msra.gmra.mxu0 %vm385_vm2, %v376_v4 }
  0xda   : > { %v427_v6 = vpop.f32.mrf.mxu0 }
  0xdb   : > { %v428_v7 = vadd.f32 %v1413_v5, %v427_v6 }
  0xdc   : > { %v1485_v8 = vpop.f32.mrf.mxu0 }
  0xdd   : > { %434 = vst.msk [vmem:[#allocation2] sm:$0xff] %vm433_vm3, %v428_v7 }
  0xde   : > { %v430_v9 = vpop.f32.mrf.mxu0 }
  0xe0   : > { %v1486_v10 = vpop.f32.mrf.mxu0 }
  0xe1 PF: > { %v1716_v11 = vmov 0.0   ;;  %v1640_v12 = vld [vmem:[%s1819_s22 + $0x18] ss:$12 sps:$4 sm:$0xff]   ;;  %vm1717_vm4 = vmmov 0   ;;  %v1641_v13 = vld [vmem:[%s1819_s22] ss:$12 sps:$4 sm:$0xff]   ;;  %v458_v16 = vlaneseq }
  0xe2   : > { %1487 = vmatprep.subr.bf16.mxu0 %v1716_v11  ;;  %1491 = vmatprep.mubr.msk.bf16.mxu0 %vm1717_vm4, %v1716_v11  ;;  %vm474_vm5 = vcmask 261120   ;;  %v1864_v19 = vld [vmem:[%s1829_s28] sm:$0xff]  ;;  %s1718_s16 = smov 120   ;;  %s1719_s18 = smov 96   ;;  %vm522_vm6 = vcmask 64512   ;;  %vm586_vm7 = vcmask 1043456  }
  0xe3   : > { %1495 = vmatprep.subr.bf16.mxu1 %v1716_v11  ;;  %1497 = vmatprep.mubr.msk.bf16.mxu1 %vm1717_vm4, %v1716_v11  ;;  %v1860_v17 = vshrl.u32 %v458_v16, 7  ;;  %s1720_s19 = smov 80   ;;  %s1721_s20 = smov 88   ;;  %vm973_vm8 = vcmask 130048   ;;  %vm975_vm9 = vcmask 195584   ;;  %vm1156_vm10 = vcmask 523264  }
  0xe4   : > { %v1848_v14 = vld [vmem:[#allocation2] sm:$0xff]  ;;  %1488 = vmatpush3.bf16.msra.mxu0 %v1640_v12  ;;  %s1722_s21 = smov 72   ;;  %s1723_s23 = smov 112  }
  0xe5   : > { %1489 = vmatprep.subr.bf16.mxu0 %v1716_v11  ;;  %v436_v15 = vpack.c.bf16 %v1848_v14, %v1848_v14  ;;  %v460_v18 = vsub.s32 0, %v1860_v17  ;;  %s1724_s24 = smov 104   ;;  %s1725_s26 = smov 56  }
  0xe6   : > { %s1726_s28 = smov 64   ;;  %s1727_s14 = smov 40  }
  0xe7   : > { %v461_v20 = vrot.slane %v1864_v19, %v460_v18  ;;  %s1728_s15 = smov 48   ;;  %s1729_s12 = smov 8  }
  0xe8   : > { %1490 = vmatpush3.bf16.msra.mxu0 %v1641_v13  ;;  %s1730_s17 = smov 16   ;;  %s1731_s11 = smov 24  }
  0xe9   : > { %1501 = vmatprep.subr.bf16.mxu0 %v1716_v11  ;;  %p1437_p8 = scmp.ge.s32.totalorder %s1696_s27, 1 }
  0xeb   : > { %1492 = vmatmul.mubr.msk.bf16.vlgmr.msra.gmra.mxu0 %vm474_vm5, %v436_v15 }
  0xec   : > { %1503 = vmatprep.mubr.msk.bf16.mxu0 %vm1717_vm4, %v1716_v11 }
 0x1ab   : > { %v512_v21 = vpop.f32.mrf.mxu0 }
 0x1ac   : > { %v513_v22 = vadd.f32 %v512_v21, %v461_v20 }
 0x1ad   : > { %v1493_v23 = vpop.f32.mrf.mxu0 }
 0x1ae   : > { %v1867_v24 = vpack.c.bf16 %v513_v22, %v513_v22 }
 0x1af   : > { %v515_v25 = vpop.f32.mrf.mxu0 }
 0x1b0   : > { %630 = vrot.lane.b32.xlu1 %v1867_v24, %s1718_s16  ;;  %520 = vrot.lane.b32.xlu0 %v1867_v24, %s1719_s18 }
 0x1b1   : > { %v1494_v26 = vpop.f32.mrf.mxu0 }
 0x1b4   : > { %742 = vrot.lane.b32.xlu1 %v1867_v24, %s1720_s19  ;;  %632 = vrot.lane.b32.xlu0 %v1867_v24, %s1721_s20 }
 0x1b8   : > { %852 = vrot.lane.b32.xlu1 %v1867_v24, %s1722_s21  ;;  %740 = vrot.lane.b32.xlu0 %v1867_v24, %s1723_s23 }
 0x1bc   : > { %850 = vrot.lane.b32.xlu0 %v1867_v24, %s1724_s24 }
 0x222   : > { %v521_v27 = vpop.permute.xlu0 %520  ;;  %v631_v30 = vpop.permute.xlu1 %630 }
 0x223   : > { %v527_v28 = vsel %vm522_vm6, %v521_v27, 0 }
 0x224   : > { %1496 = vmatpush3.bf16.xpose.msra.mxu1 %v527_v28 }
 0x225   : > { %1507 = vmatprep.subr.bf16.mxu1 %v1716_v11 }
 0x226   : > { %v633_v29 = vpop.permute.xlu0 %632  ;;  %v743_v32 = vpop.permute.xlu1 %742 }
 0x227   : > { %v638_v31 = vsel %vm522_vm6, %v633_v29, 0  ;;  %v748_v33 = vsel %vm522_vm6, %v743_v32, 0 }
 0x22a   : > { %v853_v34 = vpop.permute.xlu1 %852  ;;  %v741_v35 = vpop.permute.xlu0 %740 }
 0x22b   : > { %1498 = vmatmul.mubr.msk.bf16.vlgmr.msra.gmra.mxu1 %vm522_vm6, %v1867_v24  ;;  %v858_v36 = vsel %vm522_vm6, %v853_v34, 0 }
 0x22c   : > { %1508 = vmatpush3.bf16.xpose.msra.mxu1 %v638_v31  ;;  %1509 = vmatprep.mubr.msk.bf16.mxu1 %vm1717_vm4, %v1716_v11 }
 0x22d   : > { %1519 = vmatprep.subr.bf16.mxu1 %v1716_v11 }
 0x22e   : > { %v851_v37 = vpop.permute.xlu0 %850 }
 0x233   : > { %1510 = vmatmul.mubr.msk.bf16.vlgmr.msra.gmra.mxu1 %vm522_vm6, %v631_v30 }
 0x234   : > { %1520 = vmatpush3.bf16.xpose.msra.mxu1 %v748_v33  ;;  %1521 = vmatprep.mubr.msk.bf16.mxu1 %vm1717_vm4, %v1716_v11 }
 0x235   : > { %1531 = vmatprep.subr.bf16.mxu1 %v1716_v11 }
 0x23b   : > { %1522 = vmatmul.mubr.msk.bf16.vlgmr.msra.gmra.mxu1 %vm522_vm6, %v741_v35 }
 0x23c   : > { %1532 = vmatpush3.bf16.xpose.msra.mxu1 %v858_v36  ;;  %1533 = vmatprep.mubr.msk.bf16.mxu1 %vm1717_vm4, %v1716_v11 }
 0x23d   : > { %1543 = vmatprep.subr.bf16.mxu1 %v1716_v11 }
 0x243   : > { %1534 = vmatmul.mubr.msk.bf16.vlgmr.msra.gmra.mxu1 %vm522_vm6, %v851_v37 }
 0x244   : > { %1547 = vmatprep.mubr.msk.bf16.mxu1 %vm1717_vm4, %v1716_v11 }
 0x2eb   : > { %v563_v38 = vpop.f32.mrf.mxu1 }
 0x2ec   : > { %v569_v39 = vsel %vm522_vm6, %v563_v38, -inf }
 0x2ed   : > { %570 = vmax.xlane.f32.xlu1 %v569_v39  ;;  %v1499_v40 = vpop.f32.mrf.mxu1 }
 0x2ef   : > { %v566_v41 = vpop.f32.mrf.mxu1 }
 0x2f1   : > { %v1500_v42 = vpop.f32.mrf.mxu1 }
 0x2f3   : > { %v674_v43 = vpop.f32.mrf.mxu1 }
 0x2f4   : > { %v680_v44 = vsel %vm522_vm6, %v674_v43, -inf }
 0x2f5   : > { %681 = vmax.xlane.f32.xlu0 %v680_v44  ;;  %v1511_v45 = vpop.f32.mrf.mxu1 }
 0x2f7   : > { %v677_v46 = vpop.f32.mrf.mxu1 }
 0x2f9   : > { %v1512_v47 = vpop.f32.mrf.mxu1 }
 0x2fb   : > { %v784_v48 = vpop.f32.mrf.mxu1 }
 0x2fc   : > { %v790_v49 = vsel %vm522_vm6, %v784_v48, -inf }
 0x2fd   : > { %791 = vmax.xlane.f32.xlu0 %v790_v49  ;;  %v1523_v50 = vpop.f32.mrf.mxu1 }
 0x2fe   : > { %v1642_v50 = vld [vmem:[%s1819_s22 + $0x1c] ss:$12 sps:$4 sm:$0xff]  }
 0x2ff   : > { %v787_v51 = vpop.f32.mrf.mxu1  ;;  %1544 = vmatpush3.bf16.msra.mxu1 %v1642_v50 }
 0x300   : > { %1545 = vmatprep.subr.bf16.mxu1 %v1716_v11  ;;  %v1643_v51 = vld [vmem:[%s1819_s22 + $0x4] ss:$12 sps:$4 sm:$0xff]  }
 0x301   : > { %v1524_v52 = vpop.f32.mrf.mxu1 }
 0x303   : > { %v894_v53 = vpop.f32.mrf.mxu1  ;;  %1546 = vmatpush3.bf16.msra.mxu1 %v1643_v51 }
 0x304   : > { %v900_v54 = vsel %vm522_vm6, %v894_v53, -inf  ;;  %1559 = vmatprep.subr.bf16.mxu1 %v1716_v11 }
 0x305   : > { %901 = vmax.xlane.f32.xlu1 %v900_v54  ;;  %v1535_v55 = vpop.f32.mrf.mxu1 }
 0x307   : > { %v897_v56 = vpop.f32.mrf.mxu1 }
 0x309   : > { %v1536_v57 = vpop.f32.mrf.mxu1 }
 0x376   : > { %v571_v58 = vpop.xlane.xlu1 %570 }
 0x377   : > { %v572_v59 = vsub.f32 %v563_v38, %v571_v58 }
 0x379   : > { %v573_v60 = vmul.f32 1.442695, %v572_v59 }
 0x37b   : > { %1650 = vpow2.f32 %v573_v60 }
 0x37e   : > { %v682_v61 = vpop.xlane.xlu0 %681 }
 0x37f   : > { %v683_v62 = vsub.f32 %v674_v43, %v682_v61 }
 0x381   : > { %v684_v63 = vmul.f32 1.442695, %v683_v62 }
 0x383   : > { %1652 = vpow2.f32 %v684_v63 }
 0x386   : > { %v792_v0 = vpop.xlane.xlu0 %791 }
 0x387   : > { %v793_v1 = vsub.f32 %v784_v48, %v792_v0 }
 0x388   : > { %v1651_v2 = vpop.eup %1650 }
 0x389   : > { %v794_v3 = vmul.f32 1.442695, %v793_v1  ;;  %v575_v4 = vsel %vm522_vm6, %v1651_v2, 0.0 }
 0x38a   : > { %576 = vadd.xlane.f32.xlu0 %v575_v4 }
 0x38b   : > { %1654 = vpow2.f32 %v794_v3  ;;  %v980_v3 = vsub.s32 1, %v1860_v17 }
 0x38d   : > { %v981_v4 = vrot.slane %v1864_v19, %v980_v3  ;;  %v1216_v3 = vsub.s32 6, %v1860_v17 }
 0x38e   : > { %v902_v9 = vpop.xlane.xlu1 %901 }
 0x38f   : > { %v903_v10 = vsub.f32 %v894_v53, %v902_v9 }
 0x390   : > { %v1653_v5 = vpop.eup %1652 }
 0x391   : > { %v686_v6 = vsel %vm522_vm6, %v1653_v5, 0.0  ;;  %v904_v12 = vmul.f32 1.442695, %v903_v10 }
 0x392   : > { %687 = vadd.xlane.f32.xlu1 %v686_v6 }
 0x393   : > { %1656 = vpow2.f32 %v904_v12 }
 0x398   : > { %v1655_v7 = vpop.eup %1654 }
 0x399   : > { %v796_v8 = vsel %vm522_vm6, %v1655_v7, 0.0 }
 0x39a   : > { %797 = vadd.xlane.f32.xlu0 %v796_v8 }
 0x3a0   : > { %v1657_v13 = vpop.eup %1656 }
 0x3a1   : > { %v906_v15 = vsel %vm522_vm6, %v1657_v13, 0.0 }
 0x3a3   : > { %692 = vrot.lane.b32.xlu1 %v1867_v24, %s1725_s26 }
 0x3b0   : > { %581 = vrot.lane.b32.xlu0 %v1867_v24, %s1726_s28 }
 0x3b4   : > { %912 = vrot.lane.b32.xlu0 %v1867_v24, %s1727_s14 }
 0x3c7   : > { %907 = vadd.xlane.f32.xlu1 %v906_v15 }
 0x3d8   : > { %802 = vrot.lane.b32.xlu1 %v1867_v24, %s1728_s15 }
 0x413   : > { %v577_v16 = vpop.xlane.xlu0 %576 }
 0x414   : > { %1658 = vrcp.f32 %v577_v16 }
 0x41b   : > { %v688_v18 = vpop.xlane.xlu1 %687 }
 0x41c   : > { %1660 = vrcp.f32 %v688_v18 }
 0x41f   : > { %v693_v26 = vpop.permute.xlu1 %692 }
 0x420   : > { %v698_v29 = vsel %vm586_vm7, %v693_v26, 0  ;;  %v1054_v26 = vsub.s32 4, %v1860_v17 }
 0x421   : > { %v1659_v20 = vpop.eup %1658 }
 0x422   : > { %v579_v22 = vmul.f32 %v1659_v20, %v1651_v2 }
 0x423   : > { %v798_v21 = vpop.xlane.xlu0 %797 }
 0x424   : > { %v580_v27 = vpack.c.bf16 %v579_v22, %v579_v22  ;;  %1662 = vrcp.f32 %v798_v21  ;;  %v1644_v21 = vld [vmem:[%s1819_s22 + $0x20] ss:$12 sps:$4 sm:$0xff]   ;;  %v1645_v22 = vld [vmem:[%s1819_s22 + $0x8] ss:$12 sps:$4 sm:$0xff]  }
 0x427   : > { %v582_v23 = vpop.permute.xlu0 %581 }
 0x428   : > { %v588_v25 = vsel %vm586_vm7, %v582_v23, 0 }
 0x429   : > { %1502 = vmatpush3.bf16.msra.mxu0 %v588_v25  ;;  %v1661_v28 = vpop.eup %1660 }
 0x42a   : > { %1513 = vmatprep.subr.bf16.mxu0 %v1716_v11  ;;  %v690_v24 = vmul.f32 %v1661_v28, %v1653_v5  ;;  %v1055_v28 = vrot.slane %v1864_v19, %v1054_v26 }
 0x42b   : > { %v913_v36 = vpop.permute.xlu0 %912 }
 0x42c   : > { %1504 = vmatmul.mubr.msk.bf16.vlgmr.msra.gmra.mxu0 %vm522_vm6, %v580_v27  ;;  %v691_v30 = vpack.c.bf16 %v690_v24, %v690_v24  ;;  %v918_v38 = vsel %vm586_vm7, %v913_v36, 0  ;;  %v1059_v27 = vsub.s32 5, %v1860_v17  ;;  %v1648_v36 = vld [vmem:[%s1824_s25 + $0x8] sm:$0xff]  }
 0x42d   : > { %1514 = vmatpush3.bf16.msra.mxu0 %v698_v29  ;;  %1515 = vmatprep.mubr.msk.bf16.mxu0 %vm1717_vm4, %v1716_v11 }
 0x42e   : > { %1525 = vmatprep.subr.bf16.mxu0 %v1716_v11 }
 0x431   : > { %v1663_v31 = vpop.eup %1662 }
 0x432   : > { %v800_v33 = vmul.f32 %v1663_v31, %v1655_v7 }
 0x434   : > { %1516 = vmatmul.mubr.msk.bf16.vlgmr.msra.gmra.mxu0 %vm522_vm6, %v691_v30  ;;  %v801_v37 = vpack.c.bf16 %v800_v33, %v800_v33  ;;  %v1060_v30 = vrot.slane %v1864_v19, %v1059_v27 }
 0x435   : > { %1527 = vmatprep.mubr.msk.bf16.mxu0 %vm1717_vm4, %v1716_v11 }
 0x450   : > { %v908_v32 = vpop.xlane.xlu1 %907 }
 0x451   : > { %1664 = vrcp.f32 %v908_v32 }
 0x454   : > { %v803_v34 = vpop.permute.xlu1 %802 }
 0x455   : > { %v808_v35 = vsel %vm586_vm7, %v803_v34, 0  ;;  %v1646_v34 = vld [vmem:[%s1824_s25 + $0x18] sm:$0xff]  }
 0x456   : > { %1526 = vmatpush3.bf16.msra.mxu0 %v808_v35  ;;  %v1647_v35 = vld [vmem:[%s1824_s25 + $0x10] sm:$0xff]  }
 0x457   : > { %1537 = vmatprep.subr.bf16.mxu0 %v1716_v11 }
 0x459   : > { %1528 = vmatmul.mubr.msk.bf16.vlgmr.msra.gmra.mxu0 %vm522_vm6, %v801_v37  ;;  %v1649_v37 = vld [vmem:[%s1824_s25] sm:$0xff]  }
 0x45a   : > { %1538 = vmatpush3.bf16.msra.mxu0 %v918_v38  ;;  %1539 = vmatprep.mubr.msk.bf16.mxu0 %vm1717_vm4, %v1716_v11  ;;  %v1065_v38 = vsub.s32 2, %v1860_v17 }
 0x45b   : > { %1551 = vmatprep.subr.bf16.mxu0 %v1716_v11 }
 0x45e   : > { %v1665_v39 = vpop.eup %1664 }
 0x45f   : > { %v910_v40 = vmul.f32 %v1665_v39, %v1657_v13  ;;  %v1066_v39 = vrot.slane %v1864_v19, %v1065_v38 }
 0x461   : > { %v911_v41 = vpack.c.bf16 %v910_v40, %v910_v40 }
 0x463   : > { %1540 = vmatmul.mubr.msk.bf16.vlgmr.msra.gmra.mxu0 %vm522_vm6, %v911_v41 }
 0x464   : > { %1555 = vmatprep.mubr.msk.bf16.mxu0 %vm1717_vm4, %v1716_v11  ;;  %1552 = vmatpush3.bf16.msra.mxu0 %v1644_v21 }
 0x465   : > { %1553 = vmatprep.subr.bf16.mxu0 %v1716_v11 }
 0x468   : > { %1554 = vmatpush3.bf16.msra.mxu0 %v1645_v22 }
 0x4ec   : > { %v624_v42 = vpop.f32.mrf.mxu0 }
 0x4ee   : > { %v1505_v43 = vpop.f32.mrf.mxu0 }
 0x4f0   : > { %v627_v44 = vpop.f32.mrf.mxu0 }
 0x4f2   : > { %v1506_v45 = vpop.f32.mrf.mxu0 }
 0x4f4   : > { %v734_v46 = vpop.f32.mrf.mxu0 }
 0x4f5   : > { %961 = vrot.lane.b32.xlu1 %v734_v46, %s1729_s12 }
 0x4f6   : > { %v1517_v47 = vpop.f32.mrf.mxu0 }
 0x4f8   : > { %v737_v48 = vpop.f32.mrf.mxu0 }
 0x4fa   : > { %v1518_v49 = vpop.f32.mrf.mxu0 }
 0x519   : > { %v844_v52 = vpop.f32.mrf.mxu0 }
 0x51a   : > { %965 = vrot.lane.b32.xlu0 %v844_v52, %s1730_s17 }
 0x51b   : > { %v1529_v53 = vpop.f32.mrf.mxu0 }
 0x51d   : > { %v847_v54 = vpop.f32.mrf.mxu0 }
 0x51f   : > { %v1530_v55 = vpop.f32.mrf.mxu0 }
 0x523   : > { %v954_v56 = vpop.f32.mrf.mxu0 }
 0x524   : > { %969 = vrot.lane.b32.xlu1 %v954_v56, %s1731_s11 }
 0x525   : > { %v1541_v57 = vpop.f32.mrf.mxu0 }
 0x527   : > { %v957_v58 = vpop.f32.mrf.mxu0 }
 0x529   : > { %v1542_v59 = vpop.f32.mrf.mxu0 }
 0x567   : > { %v962_v60 = vpop.permute.xlu1 %961 }
 0x568   : > { %v972_v62 = vsel %vm522_vm6, %v624_v42, %v962_v60 }
 0x58c   : > { %v966_v61 = vpop.permute.xlu0 %965 }
 0x58d   : > { %v974_v63 = vsel %vm973_vm8, %v972_v62, %v966_v61 }
 0x596   : > { %v970_v0 = vpop.permute.xlu1 %969 }
 0x597   : > { %v976_v1 = vsel %vm975_vm9, %v974_v63, %v970_v0 }
 0x598   : > { %v977_v2 = vpack.c.bf16 %v976_v1, %v976_v1 }
 0x59a   : > { %1548 = vmatmul.mubr.msk.bf16.vlgmr.msra.gmra.mxu1 %vm474_vm5, %v977_v2 }
 0x59b   : > { %1567 = vmatprep.mubr.msk.bf16.mxu1 %vm1717_vm4, %v1716_v11  ;;  %1560 = vmatpush3.bf16.msra.mxu1 %v1646_v34 }
 0x59c   : > { %1561 = vmatprep.subr.bf16.mxu1 %v1716_v11 }
 0x59f   : > { %1562 = vmatpush3.bf16.msra.mxu1 %v1647_v35 }
 0x5a0   : > { %1563 = vmatprep.subr.bf16.mxu1 %v1716_v11 }
 0x5a3   : > { %1564 = vmatpush3.bf16.msra.mxu1 %v1648_v36 }
 0x5a4   : > { %1565 = vmatprep.subr.bf16.mxu1 %v1716_v11  ;;  %v1130_v11 = vsub.s32 3, %v1860_v17 }
 0x5a6   : > { %v1131_v51 = vrot.slane %v1864_v19, %v1130_v11 }
 0x5a7   : > { %1566 = vmatpush3.bf16.msra.mxu1 %v1649_v37 }
 0x65a   : > { %v1031_v5 = vpop.f32.mrf.mxu1 }
 0x65b   : > { %v1032_v6 = vadd.f32 %v1031_v5, %v981_v4  ;;  %v1221_v4 = vsub.s32 7, %v1860_v17  ;;  %v1217_v5 = vrot.slane %v1864_v19, %v1216_v3 }
 0x65c   : > { %v1549_v7 = vpop.f32.mrf.mxu1 }
 0x65d   : > { %v1037_v8 = vadd.f32 %v1032_v6, %v1848_v14  ;;  %v1222_v7 = vrot.slane %v1864_v19, %v1221_v4 }
 0x65e   : > { %v1034_v9 = vpop.f32.mrf.mxu1 }
 0x65f   : > { %v1038_v10 = vsel %vm474_vm5, %v1037_v8, 0.0 }
 0x660   : > { %1039 = vadd.xlane.f32.xlu0 %v1038_v10  ;;  %v1550_v12 = vpop.f32.mrf.mxu1 }
 0x6e9   : > { %v1040_v13 = vpop.xlane.xlu0 %1039 }
 0x6ea   : > { %v1042_v15 = vmul.f32 0.03125, %v1040_v13 }
 0x6ec   : > { %v1043_v16 = vsub.f32 %v1037_v8, %v1042_v15 }
 0x6ee   : > { %v1044_v18 = vmul.f32 %v1043_v16, %v1043_v16 }
 0x6f0   : > { %v1045_v20 = vsel %vm474_vm5, %v1044_v18, 0.0 }
 0x6f1   : > { %1046 = vadd.xlane.f32.xlu1 %v1045_v20 }
 0x77a   : > { %v1047_v14 = vpop.xlane.xlu1 %1046 }
 0x77b   : > { %v1048_v23 = vmul.f32 0.03125, %v1047_v14 }
 0x77d   : > { %v1049_v25 = vadd.f32 1e-06, %v1048_v23 }
 0x77f   : > { %1666 = vrsqrt.f32 %v1049_v25 }
 0x78c   : > { %v1667_v29 = vpop.eup %1666 }
 0x78d   : > { %v1051_v24 = vmul.f32 %v1667_v29, %v1043_v16 }
 0x78f   : > { %v1056_v31 = vmul.f32 %v1055_v28, %v1051_v24 }
 0x791   : > { %v1061_v32 = vadd.f32 %v1060_v30, %v1056_v31 }
 0x793   : > { %v1062_v33 = vpack.c.bf16 %v1061_v32, %v1061_v32 }
 0x795   : > { %1556 = vmatmul.mubr.msk.bf16.vlgmr.msra.gmra.mxu0 %vm474_vm5, %v1062_v33 }
 0x855   : > { %v1116_v40 = vpop.f32.mrf.mxu0 }
 0x856   : > { %v1117_v41 = vadd.f32 %v1116_v40, %v1066_v39 }
 0x857   : > { %v1557_v42 = vpop.f32.mrf.mxu0 }
 0x858   : > { %v1123_v43 = vmul.f32 0.70710677, %v1117_v41  ;;  %v1122_v47 = vmul.f32 0.5, %v1117_v41 }
 0x859   : > { %v1119_v44 = vpop.f32.mrf.mxu0 }
 0x85a   : > { %1668 = verf.f32 %v1123_v43 }
 0x85b   : > { %v1558_v45 = vpop.f32.mrf.mxu0 }
 0x867   : > { %v1669_v46 = vpop.eup %1668 }
 0x868   : > { %v1125_v48 = vadd.f32 1.0, %v1669_v46 }
 0x86a   : > { %v1126_v49 = vmul.f32 %v1125_v48, %v1122_v47 }
 0x86c   : > { %v1127_v50 = vpack.c.bf16 %v1126_v49, %v1126_v49 }
 0x86e   : > { %1568 = vmatmul.mubr.msk.bf16.vlgmr.msra.gmra.mxu1 %vm1156_vm10, %v1127_v50 }
 0x92e   : > { %v1194_v52 = vpop.f32.mrf.mxu1 }
 0x92f   : > { %v1195_v53 = vadd.f32 %v1194_v52, %v1131_v51 }
 0x930   : > { %v1569_v54 = vpop.f32.mrf.mxu1 }
 0x931   : > { %v1200_v55 = vadd.f32 %v1195_v53, %v1061_v32 }
 0x932   : > { %v1197_v56 = vpop.f32.mrf.mxu1 }
 0x933   : > { %v1201_v57 = vsel %vm474_vm5, %v1200_v55, 0.0 }
 0x934   : > { %1202 = vadd.xlane.f32.xlu0 %v1201_v57  ;;  %v1570_v58 = vpop.f32.mrf.mxu1 }
 0x9bd   : > { %v1203_v59 = vpop.xlane.xlu0 %1202 }
 0x9be   : > { %v1204_v60 = vmul.f32 0.03125, %v1203_v59 }
 0x9c0   : > { %v1205_v61 = vsub.f32 %v1200_v55, %v1204_v60 }
 0x9c2   : > { %v1206_v62 = vmul.f32 %v1205_v61, %v1205_v61 }
 0x9c4   : > { %v1207_v63 = vsel %vm474_vm5, %v1206_v62, 0.0 }
 0x9c5   : > { %1208 = vadd.xlane.f32.xlu0 %v1207_v63 }
 0xa4e   : > { %v1209_v0 = vpop.xlane.xlu0 %1208 }
 0xa4f   : > { %v1210_v1 = vmul.f32 0.03125, %v1209_v0 }
 0xa51   : > { %v1211_v2 = vadd.f32 1e-06, %v1210_v1 }
 0xa53   : > { %1670 = vrsqrt.f32 %v1211_v2 }
 0xa60   : > { %v1671_v6 = vpop.eup %1670 }
 0xa61   : > { %v1213_v8 = vmul.f32 %v1671_v6, %v1205_v61  ;;  %1227 = sbr.rel (%p1437_p8) target bundleno = 2664 (0xa68), region = 60 }
 0xa63   : > { %v1218_v9 = vmul.f32 %v1217_v5, %v1213_v8 }
 0xa65   : > { %v1223_v10 = vadd.f32 %v1222_v7, %v1218_v9 }
 0xa67   : > { %1228 = vst.msk [vmem:[#allocation2] sm:$0xff] %vm474_vm5, %v1223_v10 }
 0xa68 PF: > { %p1438_p9 = scmp.ne.s32.totalorder %s1696_s27, 1 }
 0xa6a   : > { %1232 = sbr.rel (%p1438_p9) target bundleno = 2879 (0xb3f), region = 64 }
 0xa6f   : > { %v1672_v17 = vld [vmem:[%s2002_s6 + $0x8] sm:$0xff]   ;;  %v1732_v12 = vmov 0.0   ;;  %v1673_v19 = vld [vmem:[%s2002_s6] sm:$0xff]   ;;  %vm1733_vm11 = vmmov 0   ;;  %v1233_v13 = vpack.c.bf16 %v1223_v10, %v1223_v10 }
 0xa70   : > { %1571 = vmatprep.subr.bf16.mxu0 %v1732_v12  ;;  %1575 = vmatprep.mubr.msk.bf16.mxu0 %vm1733_vm11, %v1732_v12  ;;  %v1439_v15 = vld [vmem:[%s2003_s7] ss:$0 sm:$0xff] }
 0xa71   : > { %1572 = vmatpush3.bf16.msra.mxu0 %v1672_v17 }
 0xa72   : > { %1573 = vmatprep.subr.bf16.mxu0 %v1732_v12 }
 0xa75   : > { %1574 = vmatpush3.bf16.msra.mxu0 %v1673_v19 }
 0xa78   : > { %1576 = vmatmul.mubr.msk.bf16.vlgmr.msra.gmra.mxu0 %vm474_vm5, %v1233_v13 }
 0xb38   : > { %v1294_v16 = vpop.f32.mrf.mxu0 }
 0xb39   : > { %v1295_v18 = vadd.f32 %v1439_v15, %v1294_v16 }
 0xb3a   : > { %v1577_v20 = vpop.f32.mrf.mxu0 }
 0xb3b   : > { %1300 = vst [vmem:[%s1834_s0] sm:$0xff] %v1295_v18 }
 0xb3c   : > { %v1297_v21 = vpop.f32.mrf.mxu0 }
 0xb3e   : > { %v1578_v22 = vpop.f32.mrf.mxu0 }
 0xb3f PF: > { %s18_s9 = sadd.s32 1, %s1712_s9   ;;  %s2008_s19 = sld [smem:[#allocation3_spill]] }
 0xb40   : > { %p15_p10 = scmp.ge.s32.totalorder %s18_s9, 6   ;;  %s2009_s27 = smov %s1704_s29 }
 0xb41   : > { %s2010_s28 = smov %s1708_s30  ;;  %s2011_s29 = smov %s2014_s10 }
 0xb42   :  { %17 = sbr.rel (!%p15_p10) target bundleno = 3 (0x3), region = 103 }
 0xb45   : > { %s2012_s30 = smov %s2008_s19 }

</bundles_post_ra>
